<compile_context>
chip_gen: v7x
topology: tpu7x:2x2x1
jax: 0.10.0
libtpu: 0.0.40
codegen_flags: <defaults>
</compile_context>

<pallas_src>
import functools

import jax
import jax.numpy as jnp
from jax import lax
from jax.experimental import pallas as pl
from jax.experimental.pallas import tpu as pltpu


def _round_up(x, m):
    return ((x + m - 1) // m) * m


def _step_vmem_bytes(tile_h, Wp, C, Cout, COP):
    """Per-grid-step VMEM footprint: double-buffered bf16 in/out blocks + constant
    operands, the f32 scratch band, and the dominant in-kernel f32 intermediates
    (depthwise acc + one tap, COP-wide matmul result)."""
    in_band = tile_h * Wp * C * 2              # bf16 x block
    halo = 2 * Wp * C * 2                      # bf16 top/bot halo rows
    out_band = tile_h * Wp * Cout * 2          # bf16 output block
    consts = 2 * C * 4 + 9 * C * 4 + C * COP * 2 + COP * 4
    scratch = (tile_h + 2) * (Wp + 2) * C * 4
    compute = (2 * tile_h * Wp * C + tile_h * Wp * COP) * 4
    return 2 * (in_band + halo + out_band + consts) + scratch + compute


def _pick_tile_h(N, H, Wp, C, Cout, COP, budget_bytes=6 << 20, min_steps=8):
    """Largest row-tile (divisor of H) whose per-step working set fits in
    `budget_bytes` (kept well under v5e's 16 MiB scoped-VMEM default; v6e has
    headroom to raise it, v7x/v5e should not), preferring tiles that still give
    the pipeline >= `min_steps` grid steps to hide DMA (>=16 is better on v7x's
    two TensorCores)."""
    divisors = [d for d in range(1, H + 1) if H % d == 0]
    fitting = [d for d in divisors
               if _step_vmem_bytes(d, Wp, C, Cout, COP) <= budget_bytes] or [1]
    for d in sorted(fitting, reverse=True):
        if N * (H // d) >= min_steps:
            return d
    return max(fitting)


def _depthwise_kernel(x_ref, top_ref, bot_ref, scale_ref, shift_ref,
                      dww_ref, pww_ref, pwb_ref, o_ref, pad_ref, *, w_valid):
    # x_ref:     (1, TH, Wp, C)    bf16  current row band (rows [t*TH, (t+1)*TH))
    # top_ref:   (1, 1, Wp, C)     bf16  row above the band (index clamped at border)
    # bot_ref:   (1, 1, Wp, C)     bf16  row below the band (index clamped at border)
    # scale_ref: (1, 1, C)         f32   fused BN scale = gamma / sqrt(var + eps)
    # shift_ref: (1, 1, C)         f32   fused BN shift = beta - mean * scale
    # dww_ref:   (3, 3, C)         f32   depthwise 3x3 weights (per channel)
    # pww_ref:   (C, COP)          bf16  pointwise weights, Cout zero-padded to COP
    # pwb_ref:   (1, COP)          f32   pointwise bias, zero-padded
    # o_ref:     (1, TH, Wp, Cout) bf16  (HBM never sees the COP lane padding)
    # pad_ref:   (TH+2, Wp+2, C)   f32   VMEM scratch: zero-padded BN'd band
    _, TH, Wp, C = x_ref.shape
    Cout = o_ref.shape[-1]
    t = pl.program_id(1)
    nt = pl.num_programs(1)

    scale = scale_ref[...]                               # (1, 1, C)
    shift = shift_ref[...]

    # BatchNorm (affine-fused), upcast to f32 right after load.  PyTorch zero-pads
    # AFTER the BN, so halo rows outside the image and any W-padding columns must
    # be exactly zero after the affine transform.
    xc = x_ref[0].astype(jnp.float32)                    # (TH, Wp, C)
    top = top_ref[0].astype(jnp.float32)                 # (1, Wp, C)
    bot = bot_ref[0].astype(jnp.float32)                 # (1, Wp, C)
    top_valid = (t > 0).astype(jnp.float32)
    bot_valid = (t < nt - 1).astype(jnp.float32)

    mid_bn = xc * scale + shift
    top_bn = (top * scale + shift) * top_valid
    bot_bn = (bot * scale + shift) * bot_valid
    if w_valid != Wp:                                    # static: only when W % 8 != 0
        cmask = (lax.broadcasted_iota(jnp.int32, (1, Wp, 1), 1) < w_valid)
        cmask = cmask.astype(jnp.float32)
        mid_bn = mid_bn * cmask
        top_bn = top_bn * cmask
        bot_bn = bot_bn * cmask

    # Fill the zero-padded scratch band.  Only the two border columns need to be
    # (re)zeroed each step (scratch is not zero-initialised and persists across
    # grid steps / cores); the interior is fully overwritten every step.
    zcol = jnp.zeros((TH + 2, 1, C), jnp.float32)
    pad_ref[:, 0:1, :] = zcol
    pad_ref[:, Wp + 1:Wp + 2, :] = zcol
    pad_ref[0:1, 1:Wp + 1, :] = top_bn
    pad_ref[1:TH + 1, 1:Wp + 1, :] = mid_bn
    pad_ref[TH + 1:TH + 2, 1:Wp + 1, :] = bot_bn

    # 3x3 depthwise conv: 9 static ref-slice taps out of the padded scratch,
    # f32 accumulation on the VPU (one partial + one accumulator live at a time).
    dw = dww_ref[...]                                    # (3, 3, C)
    acc = None
    for ki in range(3):
        p = pad_ref[ki:ki + TH, 0:Wp, :] * dw[ki:ki + 1, 0:1, :]
        p = p + pad_ref[ki:ki + TH, 1:Wp + 1, :] * dw[ki:ki + 1, 1:2, :]
        p = p + pad_ref[ki:ki + TH, 2:Wp + 2, :] * dw[ki:ki + 1, 2:3, :]
        acc = p if acc is None else acc + p              # (TH, Wp, C) f32

    # 1x1 pointwise conv on the MXU: bf16 x bf16 -> f32 accumulate, + bias, ReLU.
    # Slice the COP lane padding off in-register before the (bf16) store.
    out = jnp.dot(acc.reshape(TH * Wp, C).astype(jnp.bfloat16), pww_ref[...],
                  preferred_element_type=jnp.float32)    # (TH*Wp, COP)
    out = jnp.maximum(out + pwb_ref[...], 0.0)
    o_ref[0] = out[:, :Cout].reshape(TH, Wp, Cout).astype(o_ref.dtype)


def depthwise_forward(x_nchw, params, tile_h=None):
    """Forward pass matching DepthWise(in_ch, out_ch, use_stride=False), train mode."""
    N, C, H, W = x_nchw.shape
    eps = 1e-5

    # NCHW -> NHWC once; the BN batch statistics and the bf16 activation carry both
    # read this single transposed view so XLA fuses transpose + cast + reduction.
    # Variance is the centered (biased) form, matching BatchNorm / the reference.
    x_nhwc = jnp.transpose(x_nchw, (0, 2, 3, 1)).astype(jnp.float32)
    mean = jnp.mean(x_nhwc, axis=(0, 1, 2))
    var = jnp.mean(jnp.square(x_nhwc - mean), axis=(0, 1, 2))
    scale = params["gamma"] * lax.rsqrt(var + eps)
    shift = params["beta"] - mean * scale

    # bf16 activation carry; pad W to a multiple of 8 so in-kernel reshapes are
    # pure re-tilings (padded columns are masked to zero after BN inside the kernel).
    Wp = _round_up(W, 8)
    xb = x_nhwc.astype(jnp.bfloat16)
    if Wp != W:
        xb = jnp.pad(xb, ((0, 0), (0, 0), (0, Wp - W), (0, 0)))

    Cout = params["pw_w"].shape[1]
    COP = _round_up(Cout, 128)                 # lane-dense MXU operand only
    pw_w = jnp.pad(params["pw_w"].astype(jnp.bfloat16), ((0, 0), (0, COP - Cout)))
    pw_b = jnp.pad(params["pw_b"].reshape(1, Cout).astype(jnp.float32),
                   ((0, 0), (0, COP - Cout)))

    if tile_h is None:
        tile_h = _pick_tile_h(N, H, Wp, C, Cout, COP)
    if H % tile_h != 0:
        raise ValueError(f"tile_h={tile_h} must divide H={H}")
    nt = H // tile_h

    # Explicit scoped-VMEM request: 4x headroom over the working-set estimate,
    # clamped to [16 MiB, 32 MiB] so the request is valid on v5e / v6e / v7x.
    vmem_est = _step_vmem_bytes(tile_h, Wp, C, Cout, COP)
    vmem_limit = int(min(max(4 * vmem_est, 16 << 20), 32 << 20))

    # Row-band block for x / output; halo rows come from the same unpadded array
    # via 1-row blocks whose index_map clamps at the image border (the kernel
    # masks those rows to zero at the border, matching PyTorch's zero padding).
    def band_map(n, t):
        return (n, t, 0, 0)

    def top_map(n, t):
        return (n, jnp.maximum(t * tile_h - 1, 0), 0, 0)

    def bot_map(n, t):
        return (n, jnp.minimum((t + 1) * tile_h, H - 1), 0, 0)

    kernel = functools.partial(_depthwise_kernel, w_valid=W)

    out = pl.pallas_call(
        kernel,
        out_shape=jax.ShapeDtypeStruct((N, H, Wp, Cout), jnp.bfloat16),
        grid_spec=pltpu.PrefetchScalarGridSpec(
            num_scalar_prefetch=0,
            grid=(N, nt),
            in_specs=[
                pl.BlockSpec((1, tile_h, Wp, C), band_map),
                pl.BlockSpec((1, 1, Wp, C), top_map),
                pl.BlockSpec((1, 1, Wp, C), bot_map),
                pl.BlockSpec((1, 1, C), lambda n, t: (0, 0, 0)),
                pl.BlockSpec((1, 1, C), lambda n, t: (0, 0, 0)),
                pl.BlockSpec((3, 3, C), lambda n, t: (0, 0, 0)),
                pl.BlockSpec((C, COP), lambda n, t: (0, 0)),
                pl.BlockSpec((1, COP), lambda n, t: (0, 0)),
            ],
            out_specs=pl.BlockSpec((1, tile_h, Wp, Cout), band_map),
            scratch_shapes=[pltpu.VMEM((tile_h + 2, Wp + 2, C), jnp.float32)],
        ),
        compiler_params=pltpu.CompilerParams(
            dimension_semantics=("parallel", "parallel"),
            vmem_limit_bytes=vmem_limit),
    )(
        xb, xb, xb,
        scale.reshape(1, 1, C).astype(jnp.float32),
        shift.reshape(1, 1, C).astype(jnp.float32),
        params["dw_w"].astype(jnp.float32),
        pw_w, pw_b,
    )

    if Wp != W:
        out = out[:, :, :W, :]
    # TODO(synk): drop this NHWC->NCHW transpose (keep NHWC/bf16) if the consumer
    # accepts the kernel-native layout; kept here to match the PyTorch interface.
    return jnp.transpose(out, (0, 3, 1, 2))


def depthwise_reference(x_nchw, params):
    """Pure-JAX f32 reference (no Pallas) for correctness checking."""
    eps = 1e-5
    x = jnp.transpose(x_nchw, (0, 2, 3, 1)).astype(jnp.float32)
    C = x.shape[-1]
    mean = jnp.mean(x, axis=(0, 1, 2))
    var = jnp.mean(jnp.square(x - mean), axis=(0, 1, 2))
    xbn = (x - mean) / jnp.sqrt(var + eps) * params["gamma"] + params["beta"]
    dw_rhs = params["dw_w"].reshape(3, 3, 1, C)
    y = lax.conv_general_dilated(
        xbn, dw_rhs, window_strides=(1, 1), padding="SAME",
        dimension_numbers=("NHWC", "HWIO", "NHWC"),
        feature_group_count=C, precision=lax.Precision.HIGHEST)
    y = jnp.einsum("nhwc,co->nhwo", y, params["pw_w"],
                   precision=lax.Precision.HIGHEST) + params["pw_b"].reshape(1, 1, 1, -1)
    y = jnp.maximum(y, 0.0)
    return jnp.transpose(y, (0, 3, 1, 2))


if __name__ == "__main__":
    key = jax.random.PRNGKey(0)
    k_x, k_g, k_b, k_dw, k_pw, k_pb = jax.random.split(key, 6)

    N, Cin, Cout, H, W = 2, 4, 8, 16, 16
    x = jax.random.normal(k_x, (N, Cin, H, W), jnp.float32)

    # Deterministic synthetic parameters (shapes follow the PyTorch module).
    params = {
        "gamma": 1.0 + 0.1 * jax.random.normal(k_g, (Cin,), jnp.float32),   # BN weight
        "beta": 0.1 * jax.random.normal(k_b, (Cin,), jnp.float32),          # BN bias
        "dw_w": 0.2 * jax.random.normal(k_dw, (3, 3, Cin), jnp.float32),    # (C,1,3,3) -> (3,3,C)
        "pw_w": 0.2 * jax.random.normal(k_pw, (Cin, Cout), jnp.float32),    # (Cout,C,1,1) -> (C,Cout)
        "pw_b": 0.1 * jax.random.normal(k_pb, (1, Cout), jnp.float32),      # (Cout,) -> (1,Cout)
    }

    out = jax.jit(depthwise_forward)(x, params)
    out = jax.block_until_ready(out)

    ref = depthwise_reference(x, params)
    assert out.shape == (N, Cout, H, W), out.shape
    out_f32 = out.astype(jnp.float32)
    max_err = float(jnp.max(jnp.abs(out_f32 - ref)))
    # bf16 activation carry + bf16 MXU operands (f32 accumulate) + bf16 output
    # store, compared against an all-f32 reference.
    assert jnp.allclose(out_f32, ref, atol=3e-2, rtol=3e-2), max_err

    print("KERNEL_OK")
</pallas_src>

<mosaic_0001>
module attributes {stable_mosaic.version = 11 : i64} {
  func.func @_depthwise_kernel(%arg0: i32, %arg1: i32, %arg2: memref<1x4x16x4xbf16, #tpu.memory_space<vmem>>, %arg3: memref<1x1x16x4xbf16, #tpu.memory_space<vmem>>, %arg4: memref<1x1x16x4xbf16, #tpu.memory_space<vmem>>, %arg5: memref<1x1x4xf32, #tpu.memory_space<vmem>>, %arg6: memref<1x1x4xf32, #tpu.memory_space<vmem>>, %arg7: memref<3x3x4xf32, #tpu.memory_space<vmem>>, %arg8: memref<4x128xbf16, #tpu.memory_space<vmem>>, %arg9: memref<1x128xf32, #tpu.memory_space<vmem>>, %arg10: memref<1x4x16x8xbf16, #tpu.memory_space<vmem>>, %arg11: memref<6x18x4xf32, #tpu.memory_space<vmem>>) attributes {dimension_semantics = [#tpu.dimension_semantics<parallel>, #tpu.dimension_semantics<parallel>], iteration_bounds = array<i64: 2, 4>, scalar_prefetch = 0 : i64, scratch_operands = 1 : i64, tpu.core_type = #tpu.core_type<tc>, window_params = [{transform_indices = @transform_0, window_bounds = array<i64: 1, 4, 16, 4>}, {transform_indices = @transform_1, window_bounds = array<i64: 1, 1, 16, 4>}, {transform_indices = @transform_2, window_bounds = array<i64: 1, 1, 16, 4>}, {pipeline_mode = #tpu.pipeline_mode<synchronous>, transform_indices = @transform_3, window_bounds = array<i64: 1, 1, 4>}, {pipeline_mode = #tpu.pipeline_mode<synchronous>, transform_indices = @transform_4, window_bounds = array<i64: 1, 1, 4>}, {pipeline_mode = #tpu.pipeline_mode<synchronous>, transform_indices = @transform_5, window_bounds = array<i64: 3, 3, 4>}, {pipeline_mode = #tpu.pipeline_mode<synchronous>, transform_indices = @transform_6, window_bounds = array<i64: 4, 128>}, {pipeline_mode = #tpu.pipeline_mode<synchronous>, transform_indices = @transform_7, window_bounds = array<i64: 1, 128>}, {transform_indices = @transform_8, window_bounds = array<i64: 1, 4, 16, 8>}]} {
    %c0 = arith.constant 0 : index
    %c0_0 = arith.constant 0 : index
    %c0_1 = arith.constant 0 : index
    %0 = vector.load %arg5[%c0, %c0_0, %c0_1] : memref<1x1x4xf32, #tpu.memory_space<vmem>>, vector<1x1x4xf32>
    %c0_2 = arith.constant 0 : index
    %c0_3 = arith.constant 0 : index
    %c0_4 = arith.constant 0 : index
    %1 = vector.load %arg6[%c0_2, %c0_3, %c0_4] : memref<1x1x4xf32, #tpu.memory_space<vmem>>, vector<1x1x4xf32>
    %c0_5 = arith.constant 0 : index
    %c0_6 = arith.constant 0 : index
    %c0_7 = arith.constant 0 : index
    %c0_8 = arith.constant 0 : index
    %2 = vector.load %arg2[%c0_5, %c0_6, %c0_7, %c0_8] : memref<1x4x16x4xbf16, #tpu.memory_space<vmem>>, vector<1x4x16x4xbf16>
    %3 = vector.shape_cast %2 : vector<1x4x16x4xbf16> to vector<4x16x4xbf16>
    %4 = arith.extf %3 : vector<4x16x4xbf16> to vector<4x16x4xf32>
    %c0_9 = arith.constant 0 : index
    %c0_10 = arith.constant 0 : index
    %c0_11 = arith.constant 0 : index
    %c0_12 = arith.constant 0 : index
    %5 = vector.load %arg3[%c0_9, %c0_10, %c0_11, %c0_12] : memref<1x1x16x4xbf16, #tpu.memory_space<vmem>>, vector<1x1x16x4xbf16>
    %6 = vector.shape_cast %5 : vector<1x1x16x4xbf16> to vector<1x16x4xbf16>
    %7 = arith.extf %6 : vector<1x16x4xbf16> to vector<1x16x4xf32>
    %c0_13 = arith.constant 0 : index
    %c0_14 = arith.constant 0 : index
    %c0_15 = arith.constant 0 : index
    %c0_16 = arith.constant 0 : index
    %8 = vector.load %arg4[%c0_13, %c0_14, %c0_15, %c0_16] : memref<1x1x16x4xbf16, #tpu.memory_space<vmem>>, vector<1x1x16x4xbf16>
    %9 = vector.shape_cast %8 : vector<1x1x16x4xbf16> to vector<1x16x4xbf16>
    %10 = arith.extf %9 : vector<1x16x4xbf16> to vector<1x16x4xf32>
    %c0_i32 = arith.constant 0 : i32
    %11 = arith.cmpi sgt, %arg1, %c0_i32 : i32
    %12 = arith.extui %11 : i1 to i32
    %13 = arith.sitofp %12 : i32 to f32
    %c3_i32 = arith.constant 3 : i32
    %14 = arith.cmpi slt, %arg1, %c3_i32 : i32
    %15 = arith.extui %14 : i1 to i32
    %16 = arith.sitofp %15 : i32 to f32
    %17 = vector.broadcast %0 : vector<1x1x4xf32> to vector<4x16x4xf32>
    %18 = arith.mulf %4, %17 : vector<4x16x4xf32>
    %19 = vector.broadcast %1 : vector<1x1x4xf32> to vector<4x16x4xf32>
    %20 = arith.addf %18, %19 : vector<4x16x4xf32>
    %21 = vector.broadcast %0 : vector<1x1x4xf32> to vector<1x16x4xf32>
    %22 = arith.mulf %7, %21 : vector<1x16x4xf32>
    %23 = vector.broadcast %1 : vector<1x1x4xf32> to vector<1x16x4xf32>
    %24 = arith.addf %22, %23 : vector<1x16x4xf32>
    %25 = vector.broadcast %13 : f32 to vector<1x16x4xf32>
    %26 = arith.mulf %24, %25 : vector<1x16x4xf32>
    %27 = vector.broadcast %0 : vector<1x1x4xf32> to vector<1x16x4xf32>
    %28 = arith.mulf %10, %27 : vector<1x16x4xf32>
    %29 = vector.broadcast %1 : vector<1x1x4xf32> to vector<1x16x4xf32>
    %30 = arith.addf %28, %29 : vector<1x16x4xf32>
    %31 = vector.broadcast %16 : f32 to vector<1x16x4xf32>
    %32 = arith.mulf %30, %31 : vector<1x16x4xf32>
    %cst = arith.constant 0.000000e+00 : f32
    %33 = vector.broadcast %cst : f32 to vector<6x1x4xf32>
    %c0_17 = arith.constant 0 : index
    %c0_18 = arith.constant 0 : index
    %c0_19 = arith.constant 0 : index
    %34 = vector.load %arg11[%c0_17, %c0_18, %c0_19] : memref<6x18x4xf32, #tpu.memory_space<vmem>>, vector<6x1x4xf32>
    tpu.vector_store %arg11[%c0_17, %c0_18, %c0_19], %33 {strides = array<i32>} : memref<6x18x4xf32, #tpu.memory_space<vmem>>, vector<6x1x4xf32>,
    %c0_20 = arith.constant 0 : index
    %c17 = arith.constant 17 : index
    %c0_21 = arith.constant 0 : index
    %35 = vector.load %arg11[%c0_20, %c17, %c0_21] : memref<6x18x4xf32, #tpu.memory_space<vmem>>, vector<6x1x4xf32>
    tpu.vector_store %arg11[%c0_20, %c17, %c0_21], %33 {strides = array<i32>} : memref<6x18x4xf32, #tpu.memory_space<vmem>>, vector<6x1x4xf32>,
    %c0_22 = arith.constant 0 : index
    %c1 = arith.constant 1 : index
    %c0_23 = arith.constant 0 : index
    %36 = vector.load %arg11[%c0_22, %c1, %c0_23] : memref<6x18x4xf32, #tpu.memory_space<vmem>>, vector<1x16x4xf32>
    tpu.vector_store %arg11[%c0_22, %c1, %c0_23], %26 {strides = array<i32>} : memref<6x18x4xf32, #tpu.memory_space<vmem>>, vector<1x16x4xf32>,
    %c1_24 = arith.constant 1 : index
    %c1_25 = arith.constant 1 : index
    %c0_26 = arith.constant 0 : index
    %37 = vector.load %arg11[%c1_24, %c1_25, %c0_26] : memref<6x18x4xf32, #tpu.memory_space<vmem>>, vector<4x16x4xf32>
    tpu.vector_store %arg11[%c1_24, %c1_25, %c0_26], %20 {strides = array<i32>} : memref<6x18x4xf32, #tpu.memory_space<vmem>>, vector<4x16x4xf32>,
    %c5 = arith.constant 5 : index
    %c1_27 = arith.constant 1 : index
    %c0_28 = arith.constant 0 : index
    %38 = vector.load %arg11[%c5, %c1_27, %c0_28] : memref<6x18x4xf32, #tpu.memory_space<vmem>>, vector<1x16x4xf32>
    tpu.vector_store %arg11[%c5, %c1_27, %c0_28], %32 {strides = array<i32>} : memref<6x18x4xf32, #tpu.memory_space<vmem>>, vector<1x16x4xf32>,
    %c0_29 = arith.constant 0 : index
    %c0_30 = arith.constant 0 : index
    %c0_31 = arith.constant 0 : index
    %39 = vector.load %arg7[%c0_29, %c0_30, %c0_31] : memref<3x3x4xf32, #tpu.memory_space<vmem>>, vector<3x3x4xf32>
    %c0_32 = arith.constant 0 : index
    %c0_33 = arith.constant 0 : index
    %c0_34 = arith.constant 0 : index
    %40 = vector.load %arg11[%c0_32, %c0_33, %c0_34] : memref<6x18x4xf32, #tpu.memory_space<vmem>>, vector<4x16x4xf32>
    %41 = vector.extract_strided_slice %39 {offsets = [0, 0, 0], sizes = [1, 1, 4], strides = [1, 1, 1]} : vector<3x3x4xf32> to vector<1x1x4xf32>
    %42 = vector.broadcast %41 : vector<1x1x4xf32> to vector<4x16x4xf32>
    %43 = arith.mulf %40, %42 : vector<4x16x4xf32>
    %c0_35 = arith.constant 0 : index
    %c1_36 = arith.constant 1 : index
    %c0_37 = arith.constant 0 : index
    %44 = vector.load %arg11[%c0_35, %c1_36, %c0_37] : memref<6x18x4xf32, #tpu.memory_space<vmem>>, vector<4x16x4xf32>
    %45 = vector.extract_strided_slice %39 {offsets = [0, 1, 0], sizes = [1, 1, 4], strides = [1, 1, 1]} : vector<3x3x4xf32> to vector<1x1x4xf32>
    %46 = vector.broadcast %45 : vector<1x1x4xf32> to vector<4x16x4xf32>
    %47 = arith.mulf %44, %46 : vector<4x16x4xf32>
    %48 = arith.addf %43, %47 : vector<4x16x4xf32>
    %c0_38 = arith.constant 0 : index
    %c2 = arith.constant 2 : index
    %c0_39 = arith.constant 0 : index
    %49 = vector.load %arg11[%c0_38, %c2, %c0_39] : memref<6x18x4xf32, #tpu.memory_space<vmem>>, vector<4x16x4xf32>
    %50 = vector.extract_strided_slice %39 {offsets = [0, 2, 0], sizes = [1, 1, 4], strides = [1, 1, 1]} : vector<3x3x4xf32> to vector<1x1x4xf32>
    %51 = vector.broadcast %50 : vector<1x1x4xf32> to vector<4x16x4xf32>
    %52 = arith.mulf %49, %51 : vector<4x16x4xf32>
    %53 = arith.addf %48, %52 : vector<4x16x4xf32>
    %c1_40 = arith.constant 1 : index
    %c0_41 = arith.constant 0 : index
    %c0_42 = arith.constant 0 : index
    %54 = vector.load %arg11[%c1_40, %c0_41, %c0_42] : memref<6x18x4xf32, #tpu.memory_space<vmem>>, vector<4x16x4xf32>
    %55 = vector.extract_strided_slice %39 {offsets = [1, 0, 0], sizes = [1, 1, 4], strides = [1, 1, 1]} : vector<3x3x4xf32> to vector<1x1x4xf32>
    %56 = vector.broadcast %55 : vector<1x1x4xf32> to vector<4x16x4xf32>
    %57 = arith.mulf %54, %56 : vector<4x16x4xf32>
    %c1_43 = arith.constant 1 : index
    %c1_44 = arith.constant 1 : index
    %c0_45 = arith.constant 0 : index
    %58 = vector.load %arg11[%c1_43, %c1_44, %c0_45] : memref<6x18x4xf32, #tpu.memory_space<vmem>>, vector<4x16x4xf32>
    %59 = vector.extract_strided_slice %39 {offsets = [1, 1, 0], sizes = [1, 1, 4], strides = [1, 1, 1]} : vector<3x3x4xf32> to vector<1x1x4xf32>
    %60 = vector.broadcast %59 : vector<1x1x4xf32> to vector<4x16x4xf32>
    %61 = arith.mulf %58, %60 : vector<4x16x4xf32>
    %62 = arith.addf %57, %61 : vector<4x16x4xf32>
    %c1_46 = arith.constant 1 : index
    %c2_47 = arith.constant 2 : index
    %c0_48 = arith.constant 0 : index
    %63 = vector.load %arg11[%c1_46, %c2_47, %c0_48] : memref<6x18x4xf32, #tpu.memory_space<vmem>>, vector<4x16x4xf32>
    %64 = vector.extract_strided_slice %39 {offsets = [1, 2, 0], sizes = [1, 1, 4], strides = [1, 1, 1]} : vector<3x3x4xf32> to vector<1x1x4xf32>
    %65 = vector.broadcast %64 : vector<1x1x4xf32> to vector<4x16x4xf32>
    %66 = arith.mulf %63, %65 : vector<4x16x4xf32>
    %67 = arith.addf %62, %66 : vector<4x16x4xf32>
    %68 = arith.addf %53, %67 : vector<4x16x4xf32>
    %c2_49 = arith.constant 2 : index
    %c0_50 = arith.constant 0 : index
    %c0_51 = arith.constant 0 : index
    %69 = vector.load %arg11[%c2_49, %c0_50, %c0_51] : memref<6x18x4xf32, #tpu.memory_space<vmem>>, vector<4x16x4xf32>
    %70 = vector.extract_strided_slice %39 {offsets = [2, 0, 0], sizes = [1, 1, 4], strides = [1, 1, 1]} : vector<3x3x4xf32> to vector<1x1x4xf32>
    %71 = vector.broadcast %70 : vector<1x1x4xf32> to vector<4x16x4xf32>
    %72 = arith.mulf %69, %71 : vector<4x16x4xf32>
    %c2_52 = arith.constant 2 : index
    %c1_53 = arith.constant 1 : index
    %c0_54 = arith.constant 0 : index
    %73 = vector.load %arg11[%c2_52, %c1_53, %c0_54] : memref<6x18x4xf32, #tpu.memory_space<vmem>>, vector<4x16x4xf32>
    %74 = vector.extract_strided_slice %39 {offsets = [2, 1, 0], sizes = [1, 1, 4], strides = [1, 1, 1]} : vector<3x3x4xf32> to vector<1x1x4xf32>
    %75 = vector.broadcast %74 : vector<1x1x4xf32> to vector<4x16x4xf32>
    %76 = arith.mulf %73, %75 : vector<4x16x4xf32>
    %77 = arith.addf %72, %76 : vector<4x16x4xf32>
    %c2_55 = arith.constant 2 : index
    %c2_56 = arith.constant 2 : index
    %c0_57 = arith.constant 0 : index
    %78 = vector.load %arg11[%c2_55, %c2_56, %c0_57] : memref<6x18x4xf32, #tpu.memory_space<vmem>>, vector<4x16x4xf32>
    %79 = vector.extract_strided_slice %39 {offsets = [2, 2, 0], sizes = [1, 1, 4], strides = [1, 1, 1]} : vector<3x3x4xf32> to vector<1x1x4xf32>
    %80 = vector.broadcast %79 : vector<1x1x4xf32> to vector<4x16x4xf32>
    %81 = arith.mulf %78, %80 : vector<4x16x4xf32>
    %82 = arith.addf %77, %81 : vector<4x16x4xf32>
    %83 = arith.addf %68, %82 : vector<4x16x4xf32>
    %84 = vector.shape_cast %83 : vector<4x16x4xf32> to vector<64x4xf32>
    %85 = arith.truncf %84 : vector<64x4xf32> to vector<64x4xbf16>
    %c0_58 = arith.constant 0 : index
    %c0_59 = arith.constant 0 : index
    %86 = vector.load %arg8[%c0_58, %c0_59] : memref<4x128xbf16, #tpu.memory_space<vmem>>, vector<4x128xbf16>
    %cst_60 = arith.constant dense<0.000000e+00> : vector<64x128xf32>
    %87 = tpu.matmul %85, %86, %cst_60 {dimension_numbers = #tpu.dot_dimension_numbers<[1], [0], [0], [1], [0, 0, 1, 1], [], []>} : vector<64x4xbf16>, vector<4x128xbf16>, vector<64x128xf32> -> vector<64x128xf32>
    %c0_61 = arith.constant 0 : index
    %c0_62 = arith.constant 0 : index
    %88 = vector.load %arg9[%c0_61, %c0_62] : memref<1x128xf32, #tpu.memory_space<vmem>>, vector<1x128xf32>
    %89 = vector.broadcast %88 : vector<1x128xf32> to vector<64x128xf32>
    %90 = arith.addf %87, %89 : vector<64x128xf32>
    %cst_63 = arith.constant 0.000000e+00 : f32
    %91 = vector.broadcast %cst_63 : f32 to vector<64x128xf32>
    %92 = arith.maximumf %90, %91 : vector<64x128xf32>
    %93 = vector.extract_strided_slice %92 {offsets = [0, 0], sizes = [64, 8], strides = [1, 1]} : vector<64x128xf32> to vector<64x8xf32>
    %94 = vector.shape_cast %93 : vector<64x8xf32> to vector<4x16x8xf32>
    %95 = arith.truncf %94 : vector<4x16x8xf32> to vector<4x16x8xbf16>
    %c0_64 = arith.constant 0 : index
    %c0_65 = arith.constant 0 : index
    %c0_66 = arith.constant 0 : index
    %c0_67 = arith.constant 0 : index
    %96 = vector.load %arg10[%c0_64, %c0_65, %c0_66, %c0_67] : memref<1x4x16x8xbf16, #tpu.memory_space<vmem>>, vector<1x4x16x8xbf16>
    %97 = vector.shape_cast %96 : vector<1x4x16x8xbf16> to vector<4x16x8xbf16>
    %98 = vector.shape_cast %95 : vector<4x16x8xbf16> to vector<1x4x16x8xbf16>
    tpu.vector_store %arg10[%c0_64, %c0_65, %c0_66, %c0_67], %98 {strides = array<i32>} : memref<1x4x16x8xbf16, #tpu.memory_space<vmem>>, vector<1x4x16x8xbf16>,
    return
  }
  func.func @transform_0(%arg0: i32, %arg1: i32) -> (i32, i32, i32, i32) {
    %c0_i32 = arith.constant 0 : i32
    %c0_i32_0 = arith.constant 0 : i32
    %c0_i32_1 = arith.constant 0 : i32
    return %arg0, %arg1, %c0_i32, %c0_i32_0 : i32, i32, i32, i32
  }
  func.func @transform_1(%arg0: i32, %arg1: i32) -> (i32, i32, i32, i32) {
    %c4_i32 = arith.constant 4 : i32
    %0 = arith.muli %arg1, %c4_i32 : i32
    %c1_i32 = arith.constant 1 : i32
    %1 = arith.subi %0, %c1_i32 : i32
    %c0_i32 = arith.constant 0 : i32
    %2 = arith.maxsi %1, %c0_i32 : i32
    %c0_i32_0 = arith.constant 0 : i32
    %c0_i32_1 = arith.constant 0 : i32
    %c0_i32_2 = arith.constant 0 : i32
    return %arg0, %2, %c0_i32_0, %c0_i32_1 : i32, i32, i32, i32
  }
  func.func @transform_2(%arg0: i32, %arg1: i32) -> (i32, i32, i32, i32) {
    %c1_i32 = arith.constant 1 : i32
    %0 = arith.addi %arg1, %c1_i32 : i32
    %c4_i32 = arith.constant 4 : i32
    %1 = arith.muli %0, %c4_i32 : i32
    %c15_i32 = arith.constant 15 : i32
    %2 = arith.minsi %1, %c15_i32 : i32
    %c0_i32 = arith.constant 0 : i32
    %c0_i32_0 = arith.constant 0 : i32
    %c0_i32_1 = arith.constant 0 : i32
    return %arg0, %2, %c0_i32, %c0_i32_0 : i32, i32, i32, i32
  }
  func.func @transform_3(%arg0: i32, %arg1: i32) -> (i32, i32, i32) {
    %c0_i32 = arith.constant 0 : i32
    %c0_i32_0 = arith.constant 0 : i32
    %c0_i32_1 = arith.constant 0 : i32
    %c0_i32_2 = arith.constant 0 : i32
    return %c0_i32, %c0_i32_0, %c0_i32_1 : i32, i32, i32
  }
  func.func @transform_4(%arg0: i32, %arg1: i32) -> (i32, i32, i32) {
    %c0_i32 = arith.constant 0 : i32
    %c0_i32_0 = arith.constant 0 : i32
    %c0_i32_1 = arith.constant 0 : i32
    %c0_i32_2 = arith.constant 0 : i32
    return %c0_i32, %c0_i32_0, %c0_i32_1 : i32, i32, i32
  }
  func.func @transform_5(%arg0: i32, %arg1: i32) -> (i32, i32, i32) {
    %c0_i32 = arith.constant 0 : i32
    %c0_i32_0 = arith.constant 0 : i32
    %c0_i32_1 = arith.constant 0 : i32
    %c0_i32_2 = arith.constant 0 : i32
    return %c0_i32, %c0_i32_0, %c0_i32_1 : i32, i32, i32
  }
  func.func @transform_6(%arg0: i32, %arg1: i32) -> (i32, i32) {
    %c0_i32 = arith.constant 0 : i32
    %c0_i32_0 = arith.constant 0 : i32
    %c0_i32_1 = arith.constant 0 : i32
    return %c0_i32, %c0_i32_0 : i32, i32
  }
  func.func @transform_7(%arg0: i32, %arg1: i32) -> (i32, i32) {
    %c0_i32 = arith.constant 0 : i32
    %c0_i32_0 = arith.constant 0 : i32
    %c0_i32_1 = arith.constant 0 : i32
    return %c0_i32, %c0_i32_0 : i32, i32
  }
  func.func @transform_8(%arg0: i32, %arg1: i32) -> (i32, i32, i32, i32) {
    %c0_i32 = arith.constant 0 : i32
    %c0_i32_0 = arith.constant 0 : i32
    %c0_i32_1 = arith.constant 0 : i32
    return %arg0, %arg1, %c0_i32, %c0_i32_0 : i32, i32, i32, i32
  }
}

</mosaic_0001>

<bundles_post_ra>
// kernel: depthwise_forward.1
= control target key start
LH: loop header
LB: loop body
LE: loop exit
PB: predicated region body
PF: predicated region fallthrough
CT: control target
= control target key end

     0   :  { %s1350_s27 = smov 0   ;;  %s1352_s28 = smov 0   ;;  %s1708_s0 = inlined_call_operand.vmem [shape: bf16[2,16,16,4], index: 0, kind: input, shape index: {}, may-alias: {0,1,2}]   ;;  %s1709_s1 = inlined_call_operand.vmem [shape: bf16[2,16,16,4], index: 1, kind: input, shape index: {}, may-alias: {0,1,2}]   ;;  %s1710_s2 = inlined_call_operand.vmem [shape: bf16[2,16,16,4], index: 2, kind: input, shape index: {}, may-alias: {0,1,2}]   ;;  %s1711_s3 = inlined_call_operand.vmem [shape: f32[1,1,4], index: 3, kind: input, shape index: {}]   ;;  %s1712_s4 = inlined_call_operand.vmem [shape: f32[1,1,4], index: 4, kind: input, shape index: {}]   ;;  %s1713_s5 = inlined_call_operand.vmem [shape: f32[3,3,4], index: 5, kind: input, shape index: {}]   ;;  %s1714_s6 = inlined_call_operand.vmem [shape: bf16[4,128], index: 6, kind: input, shape index: {}]   ;;  %s1715_s7 = inlined_call_operand.vmem [shape: f32[1,128], index: 7, kind: input, shape index: {}]   ;;  %s1716_s8 = inlined_call_operand.vmem [shape: bf16[2,16,16,8], index: 8, kind: output, shape index: {}]  }
   0x1   :  { %s1354_s29 = smov 0   ;;  %s1356_s30 = smov 0  }
   0x2   :  { %s1358_s9 = smov 0  }
   0x3 LB: > { %s27_s10 = sadd.s32 1, %s1294_s29  ;;  %s30_s11 = sadd.s32 1, %s1298_s30  ;;  %s1302_s9 = sphi %s1358_s9, %s18_s9   ;;  %s1298_s30 = sphi %s1356_s30, %s1721_s30   ;;  %s1294_s29 = sphi %s1354_s29, %s1720_s29   ;;  %s1290_s28 = sphi %s1352_s28, %s1719_s28   ;;  %s1286_s27 = sphi %s1350_s27, %s1718_s27  }
   0x4   : > { %p28_p0 = scmp.ge.s32.totalorder %s27_s10, 4  ;;  %p1118_p1 = scmp.ge.s32.totalorder %s1302_s9, 1 }
   0x5   : > { %p348_p2 = scmp.lt.s32.totalorder %s1302_s9, 9 }
   0x6   : > { %s1723_s10 = smov (%p28_p0, %s27_s10), 0  ;;  %s1725_s11 = smov (!%p28_p0, %s30_s11), %s1298_s30 }
   0x7   : > { %p349_p3 = pnand %p1118_p1, %p348_p2  ;;  %p32_p4 = scmp.ge.s32.totalorder %s1725_s11, 2 }
   0x8   : > { %v829_v0 = vld [vmem:[%s1714_s6] sm:$0x3] (!%p349_p3)  ;;  %vm849_vm0 = vcmask (!%p349_p3), 1041408   ;;  %s1386_s14 = sshll.u32 (!%p349_p3), %s1286_s27, 2  ;;  %p419_p5 = scmp.lt.s32.totalorder (!%p349_p3), %s1290_s28, 1  ;;  %vm549_vm1 = vcmask (!%p349_p3), 24576   ;;  %v588_v3 = vlaneseq (!%p349_p3) }
   0x9   : > { %s1727_s11 = smov (%p32_p4, %s1725_s11), 0  ;;  %352 = sbr.rel (%p349_p3) target bundleno = 306 (0x132), region = 52 }
   0xa   : > { %1222 = vmatprep.subr.msk.bf16.mxu1 (!%p349_p3), %vm849_vm0, %v829_v0  ;;  %v851_v1 = vsel (!%p349_p3), %vm849_vm0, %v829_v0, 0  ;;  %1221 = vmatprep.subr.msk.bf16.mxu0 (!%p349_p3), %vm849_vm0, %v829_v0  ;;  %p421_p6 = scmp.lt.s32.totalorder (!%p349_p3), %s1386_s14, 15  ;;  %v1304_v2 = vmov (!%p349_p3), 0.0   ;;  %s1168_s17 = sadd.s32 (!%p349_p3), 4, %s1386_s14  ;;  %v1422_v4 = vld [vmem:[%s1711_s3] ss:$0 sm:$0xff] (!%p349_p3) }
   0xb   : > { %1220 = vmatpush3.bf16.msra.mxu1 (!%p349_p3), %v851_v1  ;;  %1210 = vmatpush3.bf16.msra.mxu0 (!%p349_p3), %v851_v1  ;;  %552 = vst.msk [vmem:[#allocation2 + $0x30] sm:$0x1] (!%p349_p3), %vm549_vm1, %v1304_v2  ;;  %553 = vst.msk [vmem:[#allocation2 + $0x48] sm:$0x1] (!%p349_p3), %vm549_vm1, %v1304_v2  ;;  %p1405_p7 = scmp.lt.s32.totalorder (!%p349_p3), %s1168_s17, 15  ;;  %p504_p8 = scmp.lt.s32.totalorder (!%p349_p3), %s1286_s27, 3 }
   0xc   : > { %554 = vst.msk [vmem:[#allocation2 + $0x60] sm:$0x1] (!%p349_p3), %vm549_vm1, %v1304_v2  ;;  %558 = vst.msk [vmem:[#allocation2 + $0x41] sm:$0x1] (!%p349_p3), %vm549_vm1, %v1304_v2  ;;  %vm562_vm2 = vcmask (!%p349_p3), 31744   ;;  %v589_v8 = vshrl.u32 (!%p349_p3), %v588_v3, 7 }
   0xd   : > { %559 = vst.msk [vmem:[#allocation2 + $0x59] sm:$0x1] (!%p349_p3), %vm549_vm1, %v1304_v2  ;;  %560 = vst.msk [vmem:[#allocation2 + $0x71] sm:$0x1] (!%p349_p3), %vm549_vm1, %v1304_v2  ;;  %v1436_v14 = vld [vmem:[%s1712_s4] ss:$0 sm:$0xff] (!%p349_p3) }
   0xe   : > { %550 = vst.msk [vmem:[#allocation2] sm:$0x1] (!%p349_p3), %vm549_vm1, %v1304_v2  ;;  %551 = vst.msk [vmem:[#allocation2 + $0x18] sm:$0x1] (!%p349_p3), %vm549_vm1, %v1304_v2  ;;  %v590_v34 = vsub.s32 (!%p349_p3), 0, %v589_v8  ;;  %v610_v35 = vsub.s32 (!%p349_p3), 1, %v589_v8 }
   0xf   : > { %555 = vst.msk [vmem:[#allocation2 + $0x78] sm:$0x1] (!%p349_p3), %vm549_vm1, %v1304_v2  ;;  %556 = vst.msk [vmem:[#allocation2 + $0x11] sm:$0x1] (!%p349_p3), %vm549_vm1, %v1304_v2  ;;  %v577_v37 = vld [vmem:[%s1713_s5] sm:$0x7] (!%p349_p3) }
  0x10   : > { %s1729_s28 = smov (!%p419_p5, %s1290_s28), 1  ;;  %557 = vst.msk [vmem:[#allocation2 + $0x29] sm:$0x1] %vm549_vm1, %v1304_v2  ;;  %561 = vst.msk [vmem:[#allocation2 + $0x89] sm:$0x1] %vm549_vm1, %v1304_v2  ;;  %s1731_s17 = smov (!%p1405_p7, %s1168_s17), 15  ;;  %v1483_v44 = vrot.slane %v577_v37, %v590_v34  ;;  %v1485_v45 = vrot.slane %v577_v37, %v610_v35 }
  0x11   : > { %s422_s15 = scalar_select %p421_p6, %s1386_s14, 15  ;;  %v638_v38 = vsub.s32 2, %v589_v8  ;;  %v578_v42 = vld [vmem:[%s1713_s5 + $0x4] sm:$0x7]  ;;  %v579_v43 = vld [vmem:[%s1713_s5 + $0x8] sm:$0x7] }
  0x12   : > { %s1402_s16 = sshll.u32 %s1729_s28, 5  ;;  %s1425_s28 = sadd.s32 4294967295, %s1386_s14  ;;  %v1495_v50 = vrot.slane %v578_v42, %v590_v34  ;;  %v1497_v51 = vrot.slane %v578_v42, %v610_v35  ;;  %v1509_v58 = vrot.slane %v579_v43, %v590_v34  ;;  %v1511_v59 = vrot.slane %v579_v43, %v610_v35 }
  0x13   : > { %s1120_s18 = sshll.u32 %s422_s15, 1  ;;  %s1733_s17 = smov (!%p1405_p7, %s1731_s17), 15  ;;  %v1493_v48 = vrot.slane %v577_v37, %v638_v38  ;;  %v1507_v57 = vrot.slane %v578_v42, %v638_v38  ;;  %v1513_v60 = vrot.slane %v579_v43, %v638_v38  ;;  %vm958_vm3 = vcmask 60416  }
  0x14   : > { %s1410_s20 = sadd.s32 %s1402_s16, %s1120_s18  ;;  %s1137_s15 = sshll.u32 %s1733_s17, 1 }
  0x15   : > { %s1122_s21 = sshll.u32 %s1410_s20, 2  ;;  %p431_p9 = scmp.gt.s32.totalorder %s1425_s28, 0 }
  0x16   : > { %s427_s24 = scalar_lea.vmem %s1708_s0, %s1122_s21  ;;  %s456_s18 = sadd.s32 %s1137_s15, %s1402_s16 }
  0x17   : > { %v1201_v5 = vld [vmem:[%s427_s24 + $0x8] sm:$0xff]   ;;  %v1202_v6 = vld [vmem:[%s427_s24 + $0x10] sm:$0xff]   ;;  %v1203_v7 = vld [vmem:[%s427_s24 + $0x18] sm:$0xff]   ;;  %s1431_s12 = scalar_select %p504_p8, 1, 0 }
  0x18   : > { %v1183_v9 = vunpack.c.l.bf16 %v1201_v5  ;;  %v1184_v10 = vunpack.c.h.bf16 %v1201_v5  ;;  %v1187_v11 = vunpack.c.l.bf16 %v1202_v6  ;;  %v1188_v12 = vunpack.c.h.bf16 %v1202_v6  ;;  %v1178_v13 = vld [vmem:[%s427_s24] sm:$0xff]   ;;  %s1139_s17 = sshll.u32 %s456_s18, 2  ;;  %p1125_p10 = scmp.lt.s32.totalorder %s1425_s28, 15 }
  0x19   : > { %v1191_v15 = vunpack.c.l.bf16 %v1203_v7  ;;  %v1192_v16 = vunpack.c.h.bf16 %v1203_v7  ;;  %v1179_v17 = vunpack.c.l.bf16 %v1178_v13  ;;  %v1180_v18 = vunpack.c.h.bf16 %v1178_v13  ;;  %s506_s19 = scvt.s32.f32 %s1431_s12  ;;  %s458_s24 = scalar_lea.vmem %s1710_s2, %s1139_s17 }
  0x1a   : > { %v515_v19 = vmul.f32 %v1183_v9, %v1422_v4  ;;  %v516_v20 = vmul.f32 %v1184_v10, %v1422_v4  ;;  %v517_v21 = vmul.f32 %v1187_v11, %v1422_v4  ;;  %v518_v22 = vmul.f32 %v1188_v12, %v1422_v4  ;;  %v1198_v39 = vld [vmem:[%s458_s24] sm:$0xff]   ;;  %s432_s12 = scalar_select %p431_p9, %s1425_s28, 0 }
  0x1b   : > { %v519_v23 = vmul.f32 %v1191_v15, %v1422_v4  ;;  %v520_v24 = vmul.f32 %v1192_v16, %v1422_v4  ;;  %v513_v25 = vmul.f32 %v1179_v17, %v1422_v4  ;;  %v514_v26 = vmul.f32 %v1180_v18, %v1422_v4  ;;  %p501_p11 = scmp.gt.s32.totalorder %s1286_s27, 0  ;;  %s1675_s14 = scalar_lea.vmem %s1716_s8, %s1122_s21 }
  0x1c   : > { %v529_v27 = vadd.f32 %v1436_v14, %v515_v19  ;;  %v530_v28 = vadd.f32 %v1436_v14, %v516_v20  ;;  %v531_v29 = vadd.f32 %v1436_v14, %v517_v21  ;;  %v532_v30 = vadd.f32 %v1436_v14, %v518_v22  ;;  %s1735_s12 = smov (!%p1125_p10, %s432_s12), 15 }
  0x1d   : > { %v533_v31 = vadd.f32 %v1436_v14, %v519_v23  ;;  %v534_v32 = vadd.f32 %v1436_v14, %v520_v24  ;;  %v527_v33 = vadd.f32 %v1436_v14, %v513_v25  ;;  %v528_v36 = vadd.f32 %v1436_v14, %v514_v26  ;;  %s1130_s28 = sshll.u32 %s1735_s12, 1 }
  0x1e   : > { %568 = vst.msk [vmem:[#allocation2 + $0x31] sm:$0xff] %vm562_vm2, %v529_v27  ;;  %569 = vst.msk [vmem:[#allocation2 + $0x39] sm:$0xff] %vm562_vm2, %v530_v28  ;;  %v1199_v40 = vunpack.c.l.bf16 %v1198_v39  ;;  %v1200_v41 = vunpack.c.h.bf16 %v1198_v39  ;;  %v546_v49 = vstv %s506_s19  ;;  %s1561_s17 = sadd.s32 %s1130_s28, %s1402_s16 }
  0x1f   : > { %570 = vst.msk [vmem:[#allocation2 + $0x49] sm:$0xff] %vm562_vm2, %v531_v29  ;;  %571 = vst.msk [vmem:[#allocation2 + $0x51] sm:$0xff] %vm562_vm2, %v532_v30  ;;  %s1132_s16 = sshll.u32 %s1561_s17, 2 }
  0x20   : > { %572 = vst.msk [vmem:[#allocation2 + $0x61] sm:$0xff] %vm562_vm2, %v533_v31  ;;  %573 = vst.msk [vmem:[#allocation2 + $0x69] sm:$0xff] %vm562_vm2, %v534_v32  ;;  %v542_v46 = vmul.f32 %v1199_v40, %v1422_v4  ;;  %v543_v47 = vmul.f32 %v1200_v41, %v1422_v4  ;;  %s1583_s19 = scalar_select %p501_p11, 1, 0 }
  0x21   : > { %566 = vst.msk [vmem:[#allocation2 + $0x19] sm:$0xff] %vm562_vm2, %v527_v33  ;;  %567 = vst.msk [vmem:[#allocation2 + $0x21] sm:$0xff] %vm562_vm2, %v528_v36  ;;  %s441_s24 = scalar_lea.vmem %s1709_s1, %s1132_s16 }
  0x22   : > { %v544_v52 = vadd.f32 %v1436_v14, %v542_v46  ;;  %v545_v53 = vadd.f32 %v1436_v14, %v543_v47  ;;  %s503_s27 = scvt.s32.f32 %s1583_s19 }
  0x24   : > { %v547_v3 = vmul.f32 %v546_v49, %v544_v52  ;;  %v548_v11 = vmul.f32 %v546_v49, %v545_v53 }
  0x25   : > { %v1501_v54 = vld [vmem:[#allocation2 + $0x30] sm:$0xff]  ;;  %v1503_v55 = vld [vmem:[#allocation2 + $0x38] sm:$0xff] }
  0x26   : > { %v1505_v56 = vld [vmem:[#allocation2 + $0x31] sm:$0xff]  ;;  %v596_v61 = vmul.f32 %v1483_v44, %v1501_v54  ;;  %v597_v62 = vmul.f32 %v1483_v44, %v1503_v55  ;;  %v1519_v63 = vld [vmem:[#allocation2 + $0x39] sm:$0xff]  ;;  %v1534_v8 = vld [vmem:[#allocation2 + $0x48] sm:$0xff]  ;;  %575 = vst.msk [vmem:[#allocation2 + $0x79] sm:$0xff] %vm562_vm2, %v547_v3 }
  0x27   : > { %v616_v0 = vmul.f32 %v1485_v45, %v1505_v56  ;;  %v1523_v1 = vld [vmem:[#allocation2 + $0x32] sm:$0xff]  ;;  %v1525_v2 = vld [vmem:[#allocation2 + $0x3a] sm:$0xff]  ;;  %v617_v5 = vmul.f32 %v1485_v45, %v1519_v63  ;;  %v1538_v10 = vld [vmem:[#allocation2 + $0x49] sm:$0xff]  ;;  %v672_v13 = vmul.f32 %v1495_v50, %v1534_v8  ;;  %576 = vst.msk [vmem:[#allocation2 + $0x81] sm:$0xff] %vm562_vm2, %v548_v11  ;;  %v598_v41 = vmul.f32 %v1534_v8, %v1483_v44 }
  0x28   : > { %v644_v6 = vmul.f32 %v1493_v48, %v1523_v1  ;;  %v645_v7 = vmul.f32 %v1493_v48, %v1525_v2  ;;  %v1536_v9 = vld [vmem:[#allocation2 + $0x50] sm:$0xff]  ;;  %v692_v17 = vmul.f32 %v1497_v51, %v1538_v10  ;;  %v745_v24 = vld [vmem:[#allocation2 + $0x60] sm:$0xff]  ;;  %v746_v25 = vld [vmem:[#allocation2 + $0x68] sm:$0xff]  ;;  %v618_v52 = vmul.f32 %v1538_v10, %v1485_v45 }
  0x29   : > { %v624_v12 = vadd.f32 %v616_v0, %v596_v61  ;;  %v673_v15 = vmul.f32 %v1495_v50, %v1536_v9  ;;  %v1544_v16 = vld [vmem:[#allocation2 + $0x51] sm:$0xff]  ;;  %v625_v20 = vadd.f32 %v617_v5, %v597_v62  ;;  %v765_v26 = vld [vmem:[#allocation2 + $0x61] sm:$0xff]  ;;  %v757_v29 = vmul.f32 %v1509_v58, %v745_v24  ;;  %v766_v31 = vld [vmem:[#allocation2 + $0x69] sm:$0xff] }
  0x2a   : > { %v1548_v18 = vld [vmem:[#allocation2 + $0x4a] sm:$0xff]  ;;  %v1550_v19 = vld [vmem:[#allocation2 + $0x52] sm:$0xff]  ;;  %v693_v21 = vmul.f32 %v1497_v51, %v1544_v16  ;;  %v700_v28 = vadd.f32 %v692_v17, %v672_v13  ;;  %v758_v30 = vmul.f32 %v1509_v58, %v746_v25  ;;  %v793_v32 = vld [vmem:[#allocation2 + $0x62] sm:$0xff]  ;;  %v777_v36 = vmul.f32 %v1511_v59, %v765_v26 }
  0x2b   : > { %v720_v22 = vmul.f32 %v1507_v57, %v1548_v18  ;;  %v721_v23 = vmul.f32 %v1507_v57, %v1550_v19  ;;  %v652_v27 = vadd.f32 %v644_v6, %v624_v12  ;;  %v794_v33 = vld [vmem:[#allocation2 + $0x6a] sm:$0xff]  ;;  %v653_v34 = vadd.f32 %v645_v7, %v625_v20 }
  0x2c   : > { %v701_v35 = vadd.f32 %v693_v21, %v673_v15  ;;  %v778_v37 = vmul.f32 %v1511_v59, %v766_v31  ;;  %v805_v39 = vmul.f32 %v1513_v60, %v793_v32  ;;  %v806_v40 = vmul.f32 %v1513_v60, %v794_v33 }
  0x2d   : > { %v728_v38 = vadd.f32 %v720_v22, %v700_v28  ;;  %v785_v43 = vadd.f32 %v777_v36, %v757_v29  ;;  %v599_v47 = vmul.f32 %v1536_v9, %v1483_v44  ;;  %v619_v53 = vmul.f32 %v1544_v16, %v1485_v45  ;;  %v747_v13 = vld [vmem:[#allocation2 + $0x78] sm:$0xff] }
  0x2e   : > { %v729_v42 = vadd.f32 %v721_v23, %v701_v35  ;;  %v786_v46 = vadd.f32 %v778_v37, %v758_v30  ;;  %v646_v61 = vmul.f32 %v1548_v18, %v1493_v48  ;;  %v647_v5 = vmul.f32 %v1550_v19, %v1493_v48  ;;  %v767_v15 = vld [vmem:[#allocation2 + $0x79] sm:$0xff]  ;;  %v796_v35 = vld [vmem:[#allocation2 + $0x82] sm:$0xff] }
  0x2f   : > { %v736_v49 = vadd.f32 %v728_v38, %v652_v27  ;;  %v813_v0 = vadd.f32 %v805_v39, %v785_v43  ;;  %v626_v6 = vadd.f32 %v618_v52, %v598_v41  ;;  %v627_v7 = vadd.f32 %v619_v53, %v599_v47  ;;  %v748_v23 = vld [vmem:[#allocation2 + $0x80] sm:$0xff] }
  0x30   : > { %v737_v62 = vadd.f32 %v729_v42, %v653_v34  ;;  %v814_v3 = vadd.f32 %v806_v40, %v786_v46  ;;  %v674_v11 = vmul.f32 %v745_v24, %v1495_v50  ;;  %v675_v12 = vmul.f32 %v746_v25, %v1495_v50  ;;  %v768_v27 = vld [vmem:[#allocation2 + $0x81] sm:$0xff]  ;;  %v676_v47 = vld [vmem:[#allocation2 + $0x19] sm:$0xff] }
  0x31   : > { %v821_v17 = vadd.f32 %v813_v0, %v736_v49  ;;  %v694_v21 = vmul.f32 %v765_v26, %v1497_v51  ;;  %v695_v22 = vmul.f32 %v766_v31, %v1497_v51  ;;  %v795_v28 = vld [vmem:[#allocation2 + $0x7a] sm:$0xff]  ;;  %v654_v29 = vadd.f32 %v646_v61, %v626_v6 }
  0x32   : > { %v822_v20 = vadd.f32 %v814_v3, %v737_v62  ;;  %v655_v30 = vadd.f32 %v647_v5, %v627_v7  ;;  %v722_v34 = vmul.f32 %v793_v32, %v1507_v57  ;;  %v723_v24 = vmul.f32 %v794_v33, %v1507_v57  ;;  %v1194_v25 = vld [vmem:[%s441_s24] sm:$0xff]   ;;  %v656_v26 = vld [vmem:[#allocation2 + $0x18] sm:$0xff] }
  0x33   : > { %v702_v37 = vadd.f32 %v694_v21, %v674_v11  ;;  %v703_v38 = vadd.f32 %v695_v22, %v675_v12  ;;  %v759_v39 = vmul.f32 %v1509_v58, %v747_v13  ;;  %v760_v31 = vmul.f32 %v1509_v58, %v748_v23  ;;  %v657_v61 = vld [vmem:[#allocation2 + $0x20] sm:$0xff] }
  0x34   : > { %v827_v36 = vpack.c.bf16 %v822_v20, %v821_v17  ;;  %v779_v40 = vmul.f32 %v1511_v59, %v767_v15  ;;  %v780_v41 = vmul.f32 %v1511_v59, %v768_v27  ;;  %v807_v42 = vmul.f32 %v1513_v60, %v795_v28  ;;  %v677_v0 = vld [vmem:[#allocation2 + $0x21] sm:$0xff] }
  0x35   : > { %v730_v32 = vadd.f32 %v722_v34, %v702_v37  ;;  %v731_v33 = vadd.f32 %v723_v24, %v703_v38  ;;  %v808_v43 = vmul.f32 %v1513_v60, %v796_v35  ;;  %v1195_v46 = vunpack.c.l.bf16 %v1194_v25  ;;  %v704_v3 = vld [vmem:[#allocation2 + $0x1a] sm:$0xff]  ;;  %v705_v20 = vld [vmem:[#allocation2 + $0x22] sm:$0xff] }
  0x36   : > { %1215 = vmatprep.mubr.msk.bf16.mxu1 %vm562_vm2, %v827_v36  ;;  %v787_v49 = vadd.f32 %v779_v40, %v759_v39  ;;  %v788_v52 = vadd.f32 %v780_v41, %v760_v31  ;;  %v1196_v53 = vunpack.c.h.bf16 %v1194_v25  ;;  %v668_v62 = vmul.f32 %v1495_v50, %v656_v26 }
  0x37   : > { %v738_v5 = vadd.f32 %v730_v32, %v654_v29  ;;  %v739_v6 = vadd.f32 %v731_v33, %v655_v30  ;;  %v535_v7 = vmul.f32 %v1195_v46, %v1422_v4  ;;  %v539_v11 = vstv %s503_s27 }
  0x38   : > { %v815_v12 = vadd.f32 %v807_v42, %v787_v49  ;;  %v816_v13 = vadd.f32 %v808_v43, %v788_v52  ;;  %v536_v15 = vmul.f32 %v1196_v53, %v1422_v4  ;;  %v688_v17 = vmul.f32 %v1497_v51, %v676_v47 }
  0x39   : > { %v537_v21 = vadd.f32 %v1436_v14, %v535_v7  ;;  %v669_v22 = vmul.f32 %v1495_v50, %v657_v61  ;;  %v689_v23 = vmul.f32 %v1497_v51, %v677_v0  ;;  %v716_v27 = vmul.f32 %v1507_v57, %v704_v3 }
  0x3a   : > { %v823_v28 = vadd.f32 %v815_v12, %v738_v5  ;;  %v824_v29 = vadd.f32 %v816_v13, %v739_v6  ;;  %v538_v30 = vadd.f32 %v1436_v14, %v536_v15  ;;  %v696_v34 = vadd.f32 %v688_v17, %v668_v62 }
  0x3b   : > { %v540_v24 = vmul.f32 %v539_v11, %v537_v21  ;;  %v717_v35 = vmul.f32 %v1507_v57, %v705_v20  ;;  %v753_v36 = vmul.f32 %v1509_v58, %v1501_v54  ;;  %v773_v37 = vmul.f32 %v1511_v59, %v1505_v56 }
  0x3c   : > { %v828_v4 = vpack.c.bf16 %v824_v29, %v823_v28  ;;  %v541_v25 = vmul.f32 %v539_v11, %v538_v30  ;;  %v697_v38 = vadd.f32 %v689_v23, %v669_v22  ;;  %v724_v39 = vadd.f32 %v716_v27, %v696_v34 }
  0x3d   : > { %563 = vst.msk [vmem:[#allocation2 + $0x1] sm:$0xff] %vm562_vm2, %v540_v24  ;;  %v754_v31 = vmul.f32 %v1509_v58, %v1503_v55  ;;  %v774_v14 = vmul.f32 %v1511_v59, %v1519_v63  ;;  %v801_v40 = vmul.f32 %v1513_v60, %v1523_v1  ;;  %v594_v41 = vmul.f32 %v656_v26, %v1483_v44 }
  0x3e   : > { %1216 = vmatmul.mubr.msk.bf16.vlgmr.msra.gmra.mrb[0].mxu1 %vm562_vm2, %v828_v4  ;;  %564 = vst.msk [vmem:[#allocation2 + $0x9] sm:$0xff] %vm562_vm2, %v541_v25  ;;  %v595_v42 = vmul.f32 %v657_v61, %v1483_v44  ;;  %v614_v32 = vmul.f32 %v676_v47, %v1485_v45  ;;  %v802_v33 = vmul.f32 %v1513_v60, %v1525_v2 }
  0x3f   : > { %v615_v43 = vmul.f32 %v677_v0, %v1485_v45  ;;  %v642_v46 = vmul.f32 %v704_v3, %v1493_v48  ;;  %v643_v49 = vmul.f32 %v705_v20, %v1493_v48  ;;  %v781_v52 = vadd.f32 %v773_v37, %v753_v36 }
  0x40   : > { %v622_v53 = vadd.f32 %v614_v32, %v594_v41  ;;  %v670_v62 = vmul.f32 %v1495_v50, %v1501_v54  ;;  %v671_v26 = vmul.f32 %v1495_v50, %v1503_v55  ;;  %v782_v61 = vadd.f32 %v774_v14, %v754_v31 }
  0x41   : > { %v623_v5 = vadd.f32 %v615_v43, %v595_v42  ;;  %v690_v47 = vmul.f32 %v1497_v51, %v1505_v56  ;;  %v691_v0 = vmul.f32 %v1497_v51, %v1519_v63  ;;  %v718_v3 = vmul.f32 %v1507_v57, %v1523_v1 }
  0x42   : > { %v650_v6 = vadd.f32 %v642_v46, %v622_v53  ;;  %v719_v7 = vmul.f32 %v1507_v57, %v1525_v2  ;;  %v755_v54 = vmul.f32 %v1509_v58, %v1534_v8  ;;  %v756_v12 = vmul.f32 %v1509_v58, %v1536_v9 }
  0x43   : > { %v651_v11 = vadd.f32 %v643_v49, %v623_v5  ;;  %v698_v50 = vadd.f32 %v690_v47, %v670_v62  ;;  %v699_v55 = vadd.f32 %v691_v0, %v671_v26  ;;  %v775_v51 = vmul.f32 %v1511_v59, %v1538_v10 }
  0x44   : > { %v580_v56 = vld [vmem:[#allocation2] sm:$0xff]  ;;  %v776_v63 = vmul.f32 %v1511_v59, %v1544_v16  ;;  %v803_v57 = vmul.f32 %v1513_v60, %v1548_v18  ;;  %v804_v1 = vmul.f32 %v1513_v60, %v1550_v19  ;;  %v725_v19 = vadd.f32 %v717_v35, %v697_v38 }
  0x45   : > { %v600_v13 = vld [vmem:[#allocation2 + $0x1] sm:$0xff]  ;;  %v592_v8 = vmul.f32 %v1483_v44, %v580_v56  ;;  %v601_v15 = vld [vmem:[#allocation2 + $0x9] sm:$0xff]  ;;  %v726_v17 = vadd.f32 %v718_v3, %v698_v50  ;;  %v727_v20 = vadd.f32 %v719_v7, %v699_v55  ;;  %v783_v18 = vadd.f32 %v775_v51, %v755_v54  ;;  %v1146_v35 = vld [vmem:[%s1715_s7] ss:$0 sm:$0xff] }
  0x46   : > { %v581_v2 = vld [vmem:[#allocation2 + $0x8] sm:$0xff]  ;;  %v612_v58 = vmul.f32 %v1485_v45, %v600_v13  ;;  %v613_v21 = vmul.f32 %v1485_v45, %v601_v15  ;;  %v784_v29 = vadd.f32 %v776_v63, %v756_v12  ;;  %v809_v24 = vadd.f32 %v801_v40, %v781_v52 }
  0x47   : > { %v628_v9 = vld [vmem:[#allocation2 + $0x2] sm:$0xff]  ;;  %v593_v10 = vmul.f32 %v1483_v44, %v581_v2  ;;  %v629_v59 = vld [vmem:[#allocation2 + $0xa] sm:$0xff]  ;;  %v734_v23 = vadd.f32 %v726_v17, %v650_v6  ;;  %v735_v28 = vadd.f32 %v727_v20, %v651_v11  ;;  %v811_v30 = vadd.f32 %v803_v57, %v783_v18 }
  0x48   : > { %v640_v16 = vmul.f32 %v1493_v48, %v628_v9  ;;  %v620_v22 = vadd.f32 %v612_v58, %v592_v8  ;;  %v641_v60 = vmul.f32 %v1493_v48, %v629_v59  ;;  %v810_v25 = vadd.f32 %v802_v33, %v782_v61 }
  0x49   : > { %v621_v27 = vadd.f32 %v613_v21, %v593_v10  ;;  %v812_v44 = vadd.f32 %v804_v1, %v784_v29  ;;  %v819_v45 = vadd.f32 %v811_v30, %v734_v23 }
  0x4a   : > { %v648_v34 = vadd.f32 %v640_v16, %v620_v22 }
  0x4b   : > { %v649_v4 = vadd.f32 %v641_v60, %v621_v27  ;;  %v820_v31 = vadd.f32 %v812_v44, %v735_v28 }
  0x4c   : > { %v732_v36 = vadd.f32 %v724_v39, %v648_v34 }
  0x4d   : > { %v733_v37 = vadd.f32 %v725_v19, %v649_v4  ;;  %v826_v42 = vpack.c.bf16 %v820_v31, %v819_v45 }
  0x4e   : > { %v817_v14 = vadd.f32 %v809_v24, %v732_v36 }
  0x4f   : > { %v818_v41 = vadd.f32 %v810_v25, %v733_v37 }
  0x51   : > { %v825_v48 = vpack.c.bf16 %v818_v41, %v817_v14 }
  0x53   : > { %1211 = vmatprep.mubr.msk.bf16.mxu0 %vm562_vm2, %v825_v48 }
  0x54   : > { %1212 = vmatmul.mubr.msk.bf16.vlgmr.msra.gmra.mrb[0].mxu0 %vm562_vm2, %v826_v42 }
 0x111   : > { %v1217_v38 = vpop.f32.mrb[0].mxu1 }
 0x112   : > { %v912_v40 = vadd.f32 %v1217_v38, %v1146_v35  ;;  %v903_v32 = vpop.f32.mrb[1].mxu1 }
 0x113   : > { %v904_v39 = vadd.f32 %v1146_v35, %v903_v32  ;;  %v1218_v33 = vpop.f32.mrb[2].mxu1 }
 0x114   : > { %v924_v43 = vmax.f32 %v912_v40, 0.0  ;;  %v915_v46 = vadd.f32 %v1218_v33, %v1146_v35  ;;  %v906_v49 = vpop.f32.mrb[3].mxu1 }
 0x115   : > { %v922_v52 = vmax.f32 %v904_v39, 0.0  ;;  %v907_v53 = vadd.f32 %v1146_v35, %v906_v49 }
 0x116   : > { %v1175_v62 = vpack.c.bf16 %v924_v43, %v924_v43  ;;  %v925_v26 = vmax.f32 %v915_v46, 0.0 }
 0x117   : > { %v1173_v61 = vpack.c.bf16 %v922_v52, %v922_v52  ;;  %v923_v5 = vmax.f32 %v907_v53, 0.0 }
 0x118   : > { %965 = vst.msk [vmem:[%s1675_s14 + $0x18] sm:$0xf] %vm958_vm3, %v1175_v62  ;;  %v1176_v47 = vpack.c.bf16 %v925_v26, %v925_v26 }
 0x119   : > { %963 = vst.msk [vmem:[%s1675_s14 + $0x10] sm:$0xf] %vm958_vm3, %v1173_v61  ;;  %v1174_v0 = vpack.c.bf16 %v923_v5, %v923_v5 }
 0x11a   : > { %966 = vst.msk [vmem:[%s1675_s14 + $0x1c] sm:$0xf] %vm958_vm3, %v1176_v47 }
 0x11b   : > { %964 = vst.msk [vmem:[%s1675_s14 + $0x14] sm:$0xf] %vm958_vm3, %v1174_v0 }
 0x127   : > { %v1213_v6 = vpop.f32.mrb[0].mxu0 }
 0x128   : > { %v896_v3 = vadd.f32 %v1213_v6, %v1146_v35  ;;  %v887_v7 = vpop.f32.mrb[1].mxu0 }
 0x129   : > { %v888_v54 = vadd.f32 %v1146_v35, %v887_v7  ;;  %v1214_v11 = vpop.f32.mrb[2].mxu0 }
 0x12a   : > { %v920_v50 = vmax.f32 %v896_v3, 0.0  ;;  %v899_v55 = vadd.f32 %v1214_v11, %v1146_v35  ;;  %v890_v12 = vpop.f32.mrb[3].mxu0 }
 0x12b   : > { %v918_v56 = vmax.f32 %v888_v54, 0.0  ;;  %v891_v13 = vadd.f32 %v1146_v35, %v890_v12 }
 0x12c   : > { %v1171_v51 = vpack.c.bf16 %v920_v50, %v920_v50  ;;  %v921_v63 = vmax.f32 %v899_v55, 0.0 }
 0x12d   : > { %v1169_v57 = vpack.c.bf16 %v918_v56, %v918_v56  ;;  %v919_v1 = vmax.f32 %v891_v13, 0.0 }
 0x12e   : > { %961 = vst.msk [vmem:[%s1675_s14 + $0x8] sm:$0xf] %vm958_vm3, %v1171_v51  ;;  %v1172_v2 = vpack.c.bf16 %v921_v63, %v921_v63 }
 0x12f   : > { %959 = vst.msk [vmem:[%s1675_s14] sm:$0xf] %vm958_vm3, %v1169_v57  ;;  %v1170_v8 = vpack.c.bf16 %v919_v1, %v919_v1 }
 0x130   : > { %962 = vst.msk [vmem:[%s1675_s14 + $0xc] sm:$0xf] %vm958_vm3, %v1172_v2 }
 0x131   : > { %960 = vst.msk [vmem:[%s1675_s14 + $0x4] sm:$0xf] %vm958_vm3, %v1170_v8 }
 0x132 PF: > { %s18_s9 = sadd.s32 1, %s1302_s9   ;;  %s1718_s27 = smov %s1294_s29 }
 0x133   : > { %p15_p12 = scmp.ge.s32.totalorder %s18_s9, 10   ;;  %s1719_s28 = smov %s1298_s30 }
 0x134   : > { %s1720_s29 = smov %s1723_s10  ;;  %s1721_s30 = smov %s1727_s11 }
 0x135   :  { %17 = sbr.rel (!%p15_p12) target bundleno = 3 (0x3), region = 91 }

</bundles_post_ra>
